<compile_context>
chip_gen: v6e
topology: v6e:2x2x1
jax: 0.10.0
libtpu: 0.0.40
codegen_flags: <defaults>
</compile_context>

<pallas_src>
import functools

import jax
import jax.numpy as jnp
import numpy as np
from jax.experimental import pallas as pl
from jax.experimental.pallas import tpu as pltpu

NUM_CLASSES = 2
EPS = 1e-5
K_STEP_CAP = 2048                     # max K covered by one grid step
VMEM_LIMIT = 32 * 1024 * 1024


# ------------------------------------------------------------------ utilities
def _round_up(x, m):
    return (x + m - 1) // m * m


def _pick_tn(np_pad):
    """Lane-dense output tile; keep >= 2 j-blocks when Np >= 256 (v7x megacore)."""
    if np_pad <= 128:
        return np_pad
    half = np_pad // 2
    if half % 128 == 0 and half <= 512:
        return half
    for t in (512, 384, 256, 128):
        if np_pad % t == 0:
            return t
    return 128


# ------------------------------------------------------- fused matmul kernel
def _fused_mm_kernel(a_ref, b_ref, s1_ref, t1_ref, *rest,
                     relu, has_res, has_s2, single_k):
    """acc = A @ B (fp32); epilogue: y = acc*s1 + t1 ; [+res] ; [ReLU] ; [y*s2+t2]."""
    idx = 0
    if has_s2:
        s2_ref, t2_ref = rest[idx], rest[idx + 1]
        idx += 2
    if has_res:
        r_ref = rest[idx]
        idx += 1
    o_ref = rest[idx]
    idx += 1
    acc_ref = None if single_k else rest[idx]

    def epilogue(acc):
        y = acc * s1_ref[...] + t1_ref[...]
        if has_res:
            y = y + r_ref[...].astype(jnp.float32)
        if relu:
            y = jnp.maximum(y, 0.0)
        if has_s2:
            y = y * s2_ref[...] + t2_ref[...]
        return y.astype(o_ref.dtype)

    if single_k:
        acc = jnp.dot(a_ref[...], b_ref[...], preferred_element_type=jnp.float32)
        o_ref[...] = epilogue(acc)
    else:
        k = pl.program_id(2)

        @pl.when(k == 0)
        def _():
            acc_ref[...] = jnp.zeros_like(acc_ref)

        acc_ref[...] += jnp.dot(a_ref[...], b_ref[...],
                                preferred_element_type=jnp.float32)

        @pl.when(k == pl.num_programs(2) - 1)
        def _():
            o_ref[...] = epilogue(acc_ref[...])


def fused_matmul(a, layer, relu, residual=None, out_dtype=jnp.bfloat16):
    """(M, K) @ pre-padded bf16 weight (Kp, Np) with fused epilogue -> (M, N)."""
    M, K = a.shape
    assert K == layer['K'], (K, layer['K'])
    N, Kp, Np, tk, tn = layer['N'], layer['Kp'], layer['Np'], layer['tk'], layer['tn']
    b = layer['b']

    # M tiling: 16-row base (bf16 sublane packing), up to 256 rows per block.
    Mp = _round_up(max(M, 16), 16)
    if Mp <= 256:
        tm = Mp
    else:
        tm = 256
        Mp = _round_up(Mp, tm)
    # keep >= 2 parallel blocks for v7x's two TensorCores when cheap to do so
    if (Mp // tm) * (Np // tn) == 1 and Mp >= 32:
        cand = max(16, (Mp // 2) // 16 * 16)
        if Mp % cand == 0:
            tm = cand

    a = a.astype(jnp.bfloat16)
    if Mp > M or Kp > K:
        a = jnp.pad(a, ((0, Mp - M), (0, Kp - K)))

    inputs = [a, b, layer['s1'], layer['t1']]
    in_specs = [
        pl.BlockSpec((tm, tk), lambda i, j, k: (i, k)),
        pl.BlockSpec((tk, tn), lambda i, j, k: (k, j)),
        pl.BlockSpec((1, tn), lambda i, j, k: (0, j)),
        pl.BlockSpec((1, tn), lambda i, j, k: (0, j)),
    ]
    has_s2 = 's2' in layer
    if has_s2:
        inputs += [layer['s2'], layer['t2']]
        in_specs += [pl.BlockSpec((1, tn), lambda i, j, k: (0, j)),
                     pl.BlockSpec((1, tn), lambda i, j, k: (0, j))]
    has_res = residual is not None
    if has_res:
        r = residual.astype(jnp.bfloat16)
        if Mp > M or Np > N:
            r = jnp.pad(r, ((0, Mp - M), (0, Np - N)))
        inputs.append(r)
        in_specs.append(pl.BlockSpec((tm, tn), lambda i, j, k: (i, j)))

    nk = Kp // tk
    single_k = nk == 1
    scratch = [] if single_k else [pltpu.VMEM((tm, tn), jnp.float32)]

    out = pl.pallas_call(
        functools.partial(_fused_mm_kernel, relu=relu, has_res=has_res,
                          has_s2=has_s2, single_k=single_k),
        out_shape=jax.ShapeDtypeStruct((Mp, Np), out_dtype),
        grid_spec=pltpu.PrefetchScalarGridSpec(
            num_scalar_prefetch=0,
            grid=(Mp // tm, Np // tn, nk),
            in_specs=in_specs,
            out_specs=pl.BlockSpec((tm, tn), lambda i, j, k: (i, j)),
            scratch_shapes=scratch,
        ),
        compiler_params=pltpu.CompilerParams(
            dimension_semantics=("parallel", "parallel", "arbitrary"),
            vmem_limit_bytes=VMEM_LIMIT),
    )(*inputs)

    if Mp > M or Np > N:
        out = out[:M, :N]
    return out


# --------------------------------------------------------------- maxpool kernel
def _maxpool_kernel(x_ref, o_ref):
    m = x_ref[0]
    for t in range(1, x_ref.shape[0]):
        m = jnp.maximum(m, x_ref[t])
    o_ref[...] = m


def maxpool2d(x, k=3, stride=2, pad=1):
    N, H, W, C = x.shape
    xp = jnp.pad(x, ((0, 0), (pad, pad), (pad, pad), (0, 0)),
                 constant_values=-jnp.inf)
    Ho = (H + 2 * pad - k) // stride + 1
    Wo = (W + 2 * pad - k) // stride + 1
    taps = [xp[:, i:i + (Ho - 1) * stride + 1:stride,
               j:j + (Wo - 1) * stride + 1:stride, :].reshape(N * Ho * Wo, C)
            for i in range(k) for j in range(k)]
    stk = jnp.stack(taps, axis=0)                            # (T, M, C)
    T, M, _ = stk.shape

    Mp = _round_up(max(M, 16), 16)
    if Mp > 1024:
        tmb = 512
        Mp = _round_up(Mp, tmb)
    else:
        tmb = Mp
    Cp = _round_up(max(C, 128), 128)
    if Mp > M or Cp > C:
        stk = jnp.pad(stk, ((0, 0), (0, Mp - M), (0, Cp - C)),
                      constant_values=-jnp.inf)

    out = pl.pallas_call(
        _maxpool_kernel,
        out_shape=jax.ShapeDtypeStruct((Mp, Cp), x.dtype),
        grid_spec=pltpu.PrefetchScalarGridSpec(
            num_scalar_prefetch=0,
            grid=(Mp // tmb,),
            in_specs=[pl.BlockSpec((T, tmb, Cp), lambda i: (0, i, 0))],
            out_specs=pl.BlockSpec((tmb, Cp), lambda i: (i, 0)),
        ),
        compiler_params=pltpu.CompilerParams(
            dimension_semantics=("parallel",),
            vmem_limit_bytes=VMEM_LIMIT),
    )(stk)
    return out[:M, :C].reshape(N, Ho, Wo, C)


# ----------------------------------------------------- parameter preparation
def _prep_rhs(w_mat):
    """(K, N) fp32 weight -> padded bf16 (Kp, Np) + tile metadata."""
    K, N = w_mat.shape
    Kp0 = _round_up(max(K, 128), 128)
    nk = -(-Kp0 // K_STEP_CAP)                      # ceil
    tk = _round_up(-(-Kp0 // nk), 128)
    Kp = tk * nk
    Np = _round_up(max(N, 128), 128)
    tn = _pick_tn(Np)
    b = jnp.pad(w_mat.astype(jnp.float32),
                ((0, Kp - K), (0, Np - N))).astype(jnp.bfloat16)
    return {'b': b, 'K': K, 'N': N, 'Kp': Kp, 'Np': Np, 'tk': tk, 'tn': tn}


def _prep_vec(v, Np):
    v = v.astype(jnp.float32)
    return jnp.pad(v, (0, Np - v.shape[0])).reshape(1, Np)


def _bn_scale_shift(bn):
    gamma, beta, mean, var = bn
    scale = gamma / jnp.sqrt(var + EPS)
    shift = beta - mean * scale
    return scale, shift


def prep_conv_bn(w, bn):
    """Conv weight (c_out, c_in, kh, kw) + eval-mode BN folded into s1/t1."""
    c_out, c_in, kh, kw = w.shape
    w_mat = jnp.transpose(w, (2, 3, 1, 0)).reshape(kh * kw * c_in, c_out)
    layer = _prep_rhs(w_mat)
    scale, shift = _bn_scale_shift(bn)
    layer.update(kh=kh, kw=kw,
                 s1=_prep_vec(scale, layer['Np']),
                 t1=_prep_vec(shift, layer['Np']))
    return layer


def prep_fc(w, bias, bn=None):
    """Linear (out, in) + bias; optional post-ReLU eval-mode BN fused as s2/t2."""
    layer = _prep_rhs(jnp.transpose(w))
    Np = layer['Np']
    layer.update(s1=_prep_vec(jnp.ones((layer['N'],), jnp.float32), Np),
                 t1=_prep_vec(bias, Np))
    if bn is not None:
        s2, t2 = _bn_scale_shift(bn)
        layer.update(s2=_prep_vec(s2, Np), t2=_prep_vec(t2, Np))
    return layer


# -------------------------------------------------------------- NN operations
def conv_layer(x, layer, stride, pad, relu, residual=None):
    """x: NHWC bf16. im2col + fused matmul (conv + BN [+residual] [+ReLU])."""
    N, H, W, C = x.shape
    kh, kw = layer['kh'], layer['kw']
    x = x.astype(jnp.bfloat16)
    if pad:
        x = jnp.pad(x, ((0, 0), (pad, pad), (pad, pad), (0, 0)))
    Ho = (H + 2 * pad - kh) // stride + 1
    Wo = (W + 2 * pad - kw) // stride + 1
    if kh == 1 and kw == 1:
        a = x[:, ::stride, ::stride, :].reshape(N * Ho * Wo, C)
    else:
        taps = [x[:, i:i + (Ho - 1) * stride + 1:stride,
                  j:j + (Wo - 1) * stride + 1:stride, :]
                for i in range(kh) for j in range(kw)]
        a = jnp.stack(taps, axis=3).reshape(N * Ho * Wo, kh * kw * C)
    y = fused_matmul(a, layer, relu=relu, residual=residual)
    return y.reshape(N, Ho, Wo, layer['N'])


def basic_block(x, blk):
    s = blk['stride']
    out = conv_layer(x, blk['c1'], stride=s, pad=1, relu=True)
    if 'down' in blk:
        idn = conv_layer(x, blk['down'], stride=s, pad=0, relu=False)
    else:
        idn = x
    c = blk['c2']['N']
    # conv2 + BN2 + residual add + ReLU fused into one matmul epilogue (bf16 residual).
    out = conv_layer(out, blk['c2'], stride=1, pad=1, relu=True,
                     residual=idn.reshape(-1, c))
    return out


# ------------------------------------------------------------------ parameters
def init_model(key):
    keys = iter(jax.random.split(key, 64))

    def conv_w(c_out, c_in, k):
        fan = c_in * k * k
        return (jax.random.normal(next(keys), (c_out, c_in, k, k), jnp.float32)
                * (2.0 / fan) ** 0.5)

    def bn_p(c):
        # PyTorch init: gamma=1, beta=0, running_mean=0, running_var=1.
        return (jnp.ones((c,), jnp.float32), jnp.zeros((c,), jnp.float32),
                jnp.zeros((c,), jnp.float32), jnp.ones((c,), jnp.float32))

    def linear_p(n_out, n_in):
        bound = 1.0 / np.sqrt(n_in)
        w = jax.random.uniform(next(keys), (n_out, n_in), jnp.float32,
                               -bound, bound)
        b = jax.random.uniform(next(keys), (n_out,), jnp.float32,
                               -bound, bound)
        return w, b

    cfg = [(64, 64, 1), (64, 64, 1),      # layer1
           (64, 128, 2), (128, 128, 1),   # layer2
           (128, 256, 2), (256, 256, 1),  # layer3
           (256, 512, 2), (512, 512, 1)]  # layer4

    model = {'stem': prep_conv_bn(conv_w(64, 3, 7), bn_p(64)), 'blocks': []}
    for c_in, c_out, s in cfg:
        blk = {'stride': s,
               'c1': prep_conv_bn(conv_w(c_out, c_in, 3), bn_p(c_out)),
               'c2': prep_conv_bn(conv_w(c_out, c_out, 3), bn_p(c_out))}
        if s != 1 or c_in != c_out:
            blk['down'] = prep_conv_bn(conv_w(c_out, c_in, 1), bn_p(c_out))
        model['blocks'].append(blk)

    w1, b1 = linear_p(512, 512)
    w2, b2 = linear_p(256, 512)
    w3, b3 = linear_p(NUM_CLASSES, 256)
    model['fc1'] = prep_fc(w1, b1, bn_p(512))   # Linear -> ReLU -> BN fused
    model['fc2'] = prep_fc(w2, b2, bn_p(256))   # Linear -> ReLU -> BN fused
    model['fc3'] = prep_fc(w3, b3, None)        # final Linear (bias only)
    return model


# --------------------------------------------------------------------- forward
def forward(model, x_nchw):
    # layout: NCHW (PyTorch) -> NHWC internally (channels on the lane axis), bf16.
    x = jnp.transpose(x_nchw, (0, 2, 3, 1)).astype(jnp.bfloat16)

    # stem: conv7x7/s2 + BN + ReLU fused, then 3x3/s2 maxpool
    x = conv_layer(x, model['stem'], stride=2, pad=3, relu=True)
    x = maxpool2d(x, k=3, stride=2, pad=1)

    # residual layers (bf16 activations throughout)
    for blk in model['blocks']:
        x = basic_block(x, blk)

    # global average pool
    feat = jnp.mean(x.astype(jnp.float32), axis=(1, 2))   # (N, 512)

    # custom FC head: Linear->ReLU->BN->Dropout(eval)->Linear->ReLU->BN->Dropout->Linear
    y = fused_matmul(feat, model['fc1'], relu=True)
    y = fused_matmul(y, model['fc2'], relu=True)
    y = fused_matmul(y, model['fc3'], relu=False, out_dtype=jnp.float32)
    return y                                               # (N, NUM_CLASSES)


if __name__ == "__main__":
    key = jax.random.PRNGKey(0)
    pkey, xkey = jax.random.split(key)
    model = init_model(pkey)

    # small NCHW input consistent with a ResNet-18 backbone (3 input channels)
    x = jax.random.normal(xkey, (2, 3, 32, 32), jnp.float32)

    out = forward(model, x)
    out = jax.block_until_ready(out)
    assert out.shape == (2, NUM_CLASSES), out.shape
    assert bool(jnp.all(jnp.isfinite(out)))
    print("KERNEL_OK")
</pallas_src>

<mosaic_0001>
module attributes {stable_mosaic.version = 11 : i64} {
  func.func @_fused_mm_kernel(%arg0: i32, %arg1: i32, %arg2: i32, %arg3: memref<256x256xbf16, #tpu.memory_space<vmem>>, %arg4: memref<256x128xbf16, #tpu.memory_space<vmem>>, %arg5: memref<1x128xf32, #tpu.memory_space<vmem>>, %arg6: memref<1x128xf32, #tpu.memory_space<vmem>>, %arg7: memref<256x128xbf16, #tpu.memory_space<vmem>>) attributes {dimension_semantics = [#tpu.dimension_semantics<parallel>, #tpu.dimension_semantics<parallel>, #tpu.dimension_semantics<arbitrary>], iteration_bounds = array<i64: 2, 1, 1>, scalar_prefetch = 0 : i64, scratch_operands = 0 : i64, tpu.core_type = #tpu.core_type<tc>, window_params = [{transform_indices = @transform_0, window_bounds = array<i64: 256, 256>}, {transform_indices = @transform_1, window_bounds = array<i64: 256, 128>}, {transform_indices = @transform_2, window_bounds = array<i64: 1, 128>}, {transform_indices = @transform_3, window_bounds = array<i64: 1, 128>}, {transform_indices = @transform_4, window_bounds = array<i64: 256, 128>}]} {
    %c0 = arith.constant 0 : index
    %c0_0 = arith.constant 0 : index
    %0 = vector.load %arg3[%c0, %c0_0] : memref<256x256xbf16, #tpu.memory_space<vmem>>, vector<256x256xbf16>
    %c0_1 = arith.constant 0 : index
    %c0_2 = arith.constant 0 : index
    %1 = vector.load %arg4[%c0_1, %c0_2] : memref<256x128xbf16, #tpu.memory_space<vmem>>, vector<256x128xbf16>
    %cst = arith.constant dense<0.000000e+00> : vector<256x128xf32>
    %2 = tpu.matmul %0, %1, %cst {dimension_numbers = #tpu.dot_dimension_numbers<[1], [0], [0], [1], [0, 0, 1, 1], [], []>} : vector<256x256xbf16>, vector<256x128xbf16>, vector<256x128xf32> -> vector<256x128xf32>
    %c0_3 = arith.constant 0 : index
    %c0_4 = arith.constant 0 : index
    %3 = vector.load %arg5[%c0_3, %c0_4] : memref<1x128xf32, #tpu.memory_space<vmem>>, vector<1x128xf32>
    %4 = vector.broadcast %3 : vector<1x128xf32> to vector<256x128xf32>
    %5 = arith.mulf %2, %4 : vector<256x128xf32>
    %c0_5 = arith.constant 0 : index
    %c0_6 = arith.constant 0 : index
    %6 = vector.load %arg6[%c0_5, %c0_6] : memref<1x128xf32, #tpu.memory_space<vmem>>, vector<1x128xf32>
    %7 = vector.broadcast %6 : vector<1x128xf32> to vector<256x128xf32>
    %8 = arith.addf %5, %7 : vector<256x128xf32>
    %cst_7 = arith.constant 0.000000e+00 : f32
    %9 = vector.broadcast %cst_7 : f32 to vector<256x128xf32>
    %10 = arith.maximumf %8, %9 : vector<256x128xf32>
    %11 = arith.truncf %10 : vector<256x128xf32> to vector<256x128xbf16>
    %c0_8 = arith.constant 0 : index
    %c0_9 = arith.constant 0 : index
    %12 = vector.load %arg7[%c0_8, %c0_9] : memref<256x128xbf16, #tpu.memory_space<vmem>>, vector<256x128xbf16>
    tpu.vector_store %arg7[%c0_8, %c0_9], %11 {strides = array<i32>} : memref<256x128xbf16, #tpu.memory_space<vmem>>, vector<256x128xbf16>,
    return
  }
  func.func @transform_0(%arg0: i32, %arg1: i32, %arg2: i32) -> (i32, i32) {
    %c0_i32 = arith.constant 0 : i32
    return %arg0, %arg2 : i32, i32
  }
  func.func @transform_1(%arg0: i32, %arg1: i32, %arg2: i32) -> (i32, i32) {
    %c0_i32 = arith.constant 0 : i32
    return %arg2, %arg1 : i32, i32
  }
  func.func @transform_2(%arg0: i32, %arg1: i32, %arg2: i32) -> (i32, i32) {
    %c0_i32 = arith.constant 0 : i32
    %c0_i32_0 = arith.constant 0 : i32
    return %c0_i32, %arg1 : i32, i32
  }
  func.func @transform_3(%arg0: i32, %arg1: i32, %arg2: i32) -> (i32, i32) {
    %c0_i32 = arith.constant 0 : i32
    %c0_i32_0 = arith.constant 0 : i32
    return %c0_i32, %arg1 : i32, i32
  }
  func.func @transform_4(%arg0: i32, %arg1: i32, %arg2: i32) -> (i32, i32) {
    %c0_i32 = arith.constant 0 : i32
    return %arg0, %arg1 : i32, i32
  }
}

</mosaic_0001>

<bundles_post_ra>
// kernel: tpu_custom_call.1
= control target key start
LH: loop header
LB: loop body
LE: loop exit
PB: predicated region body
PF: predicated region fallthrough
CT: control target
= control target key end

     0   :  { %s2180_s0 = inlined_call_operand.hbm [shape: bf16[512,256], index: 0, kind: input, shape index: {}]   ;;  %s2181_s1 = inlined_call_operand.hbm [shape: bf16[256,128], index: 1, kind: input, shape index: {}]   ;;  %s2182_s2 = inlined_call_operand.vmem [shape: f32[1,128], index: 2, kind: input, shape index: {}]   ;;  %s2183_s3 = inlined_call_operand.vmem [shape: f32[1,128], index: 3, kind: input, shape index: {}]   ;;  %s2184_s4 = inlined_call_operand.hbm [shape: bf16[512,128], index: 4, kind: output, shape index: {}]  }
   0x1   :  { %2186 = sst [smem:[#allocation11_spill]] %s2181_s1 }
   0x2   :  { %9 = vsyncpa [#allocation3], 0 }
   0x3   :  { %11 = vsyncpa [#allocation3 + $0x1], 0 }
   0x4   :  { %12 = vsyncpa [#allocation6], 0 }
   0x5   :  { %13 = vsyncpa [#allocation4], 0 }
   0x6   :  { %15 = vsyncpa [#allocation4 + $0x1], 0  ;;  %s1871_s15 = smov 0   ;;  %s1873_s16 = smov 0  }
   0x7   :  { %s1875_s17 = smov 0   ;;  %s1877_s18 = smov 0  }
   0x8   :  { %s1879_s19 = smov 0   ;;  %s1881_s20 = smov 0  }
   0x9 LB: > { %s1194_s21 = sadd.s32 4294967295, %s1835_s20   ;;  %s1195_s22 = sadd.s32 4294967294, %s1835_s20   ;;  %s1835_s20 = sphi %s1881_s20, %s21_s20   ;;  %s1831_s19 = sphi %s1879_s19, %s2204_s19   ;;  %s1827_s18 = sphi %s1877_s18, %s2203_s18   ;;  %s1823_s17 = sphi %s1875_s17, %s2202_s17   ;;  %s1819_s16 = sphi %s1873_s16, %s2201_s16   ;;  %s1815_s15 = sphi %s1871_s15, %s2200_s15  }
   0xa   : > { %p62_p0 = scmp.ne.s32.totalorder %s1819_s16, %s1815_s15  ;;  %p1905_p1 = scmp.eq.s32.totalorder %s1194_s21, 0 }
   0xb   : > { %p1909_p2 = scmp.eq.s32.totalorder %s1194_s21, 1  ;;  %p174_p3 = scmp.eq.s32.totalorder %s1195_s22, 1 }
   0xc   : > { %p1915_p4 = por %p1905_p1, %p62_p0  ;;  %p1196_p5 = scmp.ge.s32.totalorder %s1835_s20, 1 }
   0xd   : > { %p1920_p6 = por %p174_p3, %p62_p0  ;;  %p181_p7 = scmp.lt.s32.totalorder %s1835_s20, 3 }
   0xe   : > { %s2189_s25 = scalar_select %p1915_p4, 1, 0 }
   0xf   : > { %s2190_s26 = scalar_select %p1920_p6, 1, 0 }
  0x10   : > { %p1925_p8 = pnand %p1196_p5, %p181_p7  ;;  %s1837_s28 = smov [#allocation5]  }
  0x11   : > { %s197_s29 = sshll.u32 %s1837_s28, 4  ;;  %s40_s5 = sadd.s32 1, %s1831_s19  ;;  %s198_s29 = int_to_ptr.vmem [resolvable:$true] %s197_s29 }
  0x12   : > { %p1562_p9 = pneg %p1925_p8  ;;  %s1708_s6 = scalar_lea.vmem %s198_s29, 2048 }
  0x13   : > { %p1709_p13 = scmp.ne.s32.totalorder %s198_s29, %s1708_s6  ;;  %p1716_p5 = scmp.lt.s32.totalorder %s198_s29, %s198_s29 }
  0x14   : > { %p1934_p11 = pnand %p1562_p9, %p1905_p1  ;;  %p1717_p7 = scmp.lt.s32.totalorder %s1708_s6, %s1708_s6 }
  0x16   : > { %p1699_p12 = pneg %p1934_p11  ;;  %p1718_p6 = por %p1717_p7, %p1716_p5 }
  0x18   : > { %p1711_p0 = pnand %p1709_p13, %p1699_p12 }
  0x1a   : > { %p1712_p3 = pneg %p1711_p0 }
  0x1c   : > { %p1719_p4 = pnand %p1718_p6, %p1712_p3 }
  0x1e   : > { %1722 = shalt.err (!%p1719_p4)
}
  0x1f   : > { %s1838_s7 = smov 64   ;;  %s1839_s8 = smov 4  }
  0x20   : > { %s2193_s1 = sld [smem:[#allocation11_spill]]  ;;  %p42_p6 = scmp.ge.s32.totalorder %s40_s5, 2 }
  0x21   : > { %s49_s11 = sadd.s32 1, %s1823_s17  ;;  %p56_p4 = scmp.ne.s32.totalorder %s1823_s17, %s1819_s16 }
  0x22   : > { %p57_p9 = scmp.eq.s32.totalorder %s1835_s20, 0  ;;  %s2206_s5 = smov (%p42_p6, %s40_s5), 0 }
  0x23   : > { %p1958_p13 = por %p1909_p2, %p56_p4  ;;  %s44_s14 = ssub.s32 %s1831_s19, %s2206_s5 }
  0x24   : > { %p1952_p12 = por %p57_p9, %p56_p4  ;;  %p1575_p0 = scmp.lt.s32.totalorder %s1835_s20, 2 }
  0x25   : > { %s223_s21 = sand.u32 1, %s1823_s17  }
  0x26   : > { %1565 = dma.hbm_to_vmem [thread:$0]  (!%p1934_p11), %s2193_s1, 2048, %s198_s29, [#allocation6], %s1838_s7, %s1838_s7, %s1839_s8  }
  0x27   : > { %p47_p11 = scmp.eq.s32.totalorder %s44_s14, 0  ;;  %s1201_s22 = sshll.u32 %s223_s21, 8 }
  0x28   : > { %s1297_s29 = sshll.u32 %s1831_s19, 12  ;;  %s227_s8 = scalar_lea.vmem [#allocation2], %s1201_s22 }
  0x29   : > { %s1967_s28 = scalar_select %p47_p11, %s1823_s17, %s49_s11  }
  0x2a   : > { %s236_s7 = scalar_lea.hbm %s2180_s0, %s1297_s29  ;;  %s237_s9 = sshll.u32 %s227_s8, 4  ;;  %s238_s9 = int_to_ptr.vmem [resolvable:$true] %s237_s9 }
  0x2b   : > { %p1975_p2 = pnand %p1575_p0, %p1952_p12  ;;  %s224_s10 = scalar_lea.sflag [#allocation3], %s223_s21 }
  0x2c   : > { %s1736_s14 = scalar_lea.vmem %s238_s9, 4096  ;;  %s1840_s11 = smov [#allocation2]  }
  0x2d   : > { %p1725_p3 = pneg %p1975_p2  ;;  %p1737_p5 = scmp.ne.s32.totalorder %s238_s9, %s1736_s14 }
  0x2e   : > { %s1741_s1 = sshll.u32 %s1840_s11, 4  ;;  %s1742_s1 = int_to_ptr.vmem [resolvable:$false] %s1741_s1 }
  0x2f   : > { %p1739_p7 = pnand %p1737_p5, %p1725_p3  ;;  %s1743_s29 = scalar_lea.vmem %s1742_s1, 8192 }
  0x30   : > { %p1744_p4 = scmp.lt.s32.totalorder %s238_s9, %s1742_s1  ;;  %p1745_p9 = scmp.lt.s32.totalorder %s1743_s29, %s1736_s14 }
  0x31   : > { %p1740_p6 = pneg %p1739_p7 }
  0x32   : > { %p1746_p11 = por %p1745_p9, %p1744_p4 }
  0x34   : > { %p1747_p10 = pnand %p1746_p11, %p1740_p6 }
  0x36   : > { %1750 = shalt.err (!%p1747_p10)
}
  0x37   : > { %s1841_s12 = smov 128   ;;  %s1842_s22 = smov 8  }
  0x38   : > { %1569 = dma.hbm_to_vmem [thread:$0]  (!%p1975_p2), %s236_s7, 4096, %s238_s9, %s224_s10, %s1841_s12, %s1841_s12, %s1842_s22  }
  0x39   : > { %249 = sbr.rel (%p1925_p8) target bundleno = 377 (0x179), region = 36  ;;  %s1986_s21 = sand.u32 (!%p1925_p8), 1, %s1819_s16  }
  0x3a   : > { %s1206_s30 = sshll.u32 (!%p1925_p8), %s1986_s21, 8  ;;  %s252_s1 = scalar_lea.sflag (!%p1925_p8), [#allocation3], %s1986_s21 }
  0x3b   : > { %s1990_s6 = scalar_lea.vmem (!%p1925_p8), [#allocation2], %s1206_s30  ;;  %p2197_p12 = scmp.ne.s32.totalorder (!%p1925_p8), %s2189_s25, 0 }
  0x3e   : > { %1802 = dma.done.wait (%p2197_p12), %s252_s1, 4096  }
  0x3f   : > { %1804 = vsyncadd (%p2197_p12), %s252_s1, 4294963200 }
  0x40   : > { %1806 = dma.done.wait (%p1905_p1), [#allocation6], 2048  }
  0x41   : > { %1808 = vsyncadd (%p1905_p1), [#allocation6], 4294965248  ;;  %v1633_v0 = vld [vmem:[#allocation5 + $0x78] sm:$0xff]   ;;  %v1635_v2 = vld [vmem:[#allocation5 + $0x70] sm:$0xff]   ;;  %s1208_s8 = sshll.u32 %s1986_s21, 7  ;;  %s1330_s24 = sshll.u32 %s1827_s18, 11 }
  0x42   : > { %v1634_v1 = vld [vmem:[#allocation5 + $0x38] sm:$0xff]   ;;  %1426 = vmatprep.subr.bf16.mxu0 %v1633_v0  ;;  %1538 = vmatprep.subr.bf16.mxu1 %v1633_v0  ;;  %v1636_v3 = vld [vmem:[#allocation5 + $0x30] sm:$0xff]   ;;  %v1637_v4 = vld [vmem:[#allocation5 + $0x68] sm:$0xff]   ;;  %s2053_s9 = scalar_lea.vmem [#allocation7], %s1208_s8  ;;  %s2128_s29 = scalar_lea.hbm %s2184_s4, %s1330_s24 }
  0x43   : > { %1427 = vmatpush3.bf16.msra.mxu0 %v1634_v1  ;;  %1546 = vmatpush3.bf16.msra.mxu1 %v1634_v1  ;;  %v1638_v5 = vld [vmem:[#allocation5 + $0x28] sm:$0xff]   ;;  %v1639_v6 = vld [vmem:[#allocation5 + $0x60] sm:$0xff]   ;;  %v1641_v8 = vld [vmem:[#allocation5 + $0x58] sm:$0xff]   ;;  %s1067_s10 = sshll.u32 %s2053_s9, 4  ;;  %s1053_s18 = scalar_lea.sflag [#allocation4], %s1986_s21  ;;  %s2130_s10 = int_to_ptr.vmem [resolvable:$true] %s1067_s10 }
  0x44   : > { %1428 = vmatprep.subr.bf16.mxu0 %v1635_v2  ;;  %1539 = vmatprep.subr.bf16.mxu1 %v1635_v2  ;;  %v1640_v7 = vld [vmem:[#allocation5 + $0x20] sm:$0xff]   ;;  %v1642_v9 = vld [vmem:[#allocation5 + $0x18] sm:$0xff]   ;;  %v1643_v10 = vld [vmem:[#allocation5 + $0x50] sm:$0xff]   ;;  %s1751_s12 = scalar_lea.vmem %s2130_s10, 2048  ;;  %s1843_s22 = smov [#allocation7]  }
  0x45   : > { %v1651_v11 = vld [vmem:[%s1990_s6 + $0x4] ss:$8 sps:$4 sm:$0xff]   ;;  %v1644_v13 = vld [vmem:[#allocation5 + $0x10] sm:$0xff]   ;;  %v1649_v18 = vld [vmem:[%s1990_s6] ss:$8 sps:$4 sm:$0xff]   ;;  %p1752_p1 = scmp.ne.s32.totalorder %s2130_s10, %s1751_s12  ;;  %s1755_s30 = sshll.u32 %s1843_s22, 4  ;;  %s1756_s30 = int_to_ptr.vmem [resolvable:$false] %s1755_s30 }
  0x46   : > { %v1654_v12 = vld [vmem:[%s1990_s6 + $0x84] ss:$8 sps:$4 sm:$0xff]   ;;  %653 = vmatprep.mubr.bf16.mxu0 %v1651_v11  ;;  %v1652_v19 = vld [vmem:[%s1990_s6 + $0x80] ss:$8 sps:$4 sm:$0xff]   ;;  %v1655_v20 = vld [vmem:[%s1990_s6 + $0x14] ss:$8 sps:$4 sm:$0xff]   ;;  %p1758_p0 = scmp.lt.s32.totalorder %s2130_s10, %s1756_s30 }
  0x47   : > { %1429 = vmatpush3.bf16.msra.mxu0 %v1636_v3  ;;  %1547 = vmatpush3.bf16.msra.mxu1 %v1636_v3  ;;  %v1645_v14 = vld [vmem:[#allocation5 + $0x48] sm:$0xff]   ;;  %v1647_v16 = vld [vmem:[#allocation5 + $0x40] sm:$0xff]   ;;  %v1657_v21 = vld [vmem:[%s1990_s6 + $0x94] ss:$8 sps:$4 sm:$0xff]   ;;  %p1753_p8 = pnand %p1752_p1, %p1958_p13  ;;  %s1757_s1 = scalar_lea.vmem %s1756_s30, 4096 }
  0x48   : > { %1430 = vmatprep.subr.bf16.mxu0 %v1637_v4  ;;  %1540 = vmatprep.subr.bf16.mxu1 %v1637_v4  ;;  %v1646_v15 = vld [vmem:[#allocation5 + $0x8] sm:$0xff]   ;;  %v1648_v17 = vld [vmem:[#allocation5] sm:$0xff]   ;;  %v1659_v22 = vld [vmem:[%s1990_s6 + $0x10] ss:$8 sps:$4 sm:$0xff]   ;;  %p1759_p2 = scmp.lt.s32.totalorder %s1757_s1, %s1751_s12 }
  0x49   : > { %717 = vmatprep.mubr.bf16.mxu1 %v1654_v12  ;;  %v1660_v23 = vld [vmem:[%s1990_s6 + $0x90] ss:$8 sps:$4 sm:$0xff]   ;;  %v1661_v24 = vld [vmem:[%s1990_s6 + $0x24] ss:$8 sps:$4 sm:$0xff]   ;;  %v1665_v26 = vld [vmem:[%s1990_s6 + $0x20] ss:$8 sps:$4 sm:$0xff]   ;;  %p1754_p10 = pneg %p1753_p8 }
  0x4a   : > { %v1663_v25 = vld [vmem:[%s1990_s6 + $0xa4] ss:$8 sps:$4 sm:$0xff]   ;;  %v1666_v27 = vld [vmem:[%s1990_s6 + $0xa0] ss:$8 sps:$4 sm:$0xff]   ;;  %v1667_v28 = vld [vmem:[%s1990_s6 + $0x34] ss:$8 sps:$4 sm:$0xff]   ;;  %p1760_p3 = por %p1759_p2, %p1758_p0 }
  0x4b   : > { %1431 = vmatpush3.bf16.msra.mxu0 %v1638_v5  ;;  %1548 = vmatpush3.bf16.msra.mxu1 %v1638_v5  ;;  %v1669_v29 = vld [vmem:[%s1990_s6 + $0xb4] ss:$8 sps:$4 sm:$0xff]   ;;  %v1671_v30 = vld [vmem:[%s1990_s6 + $0x30] ss:$8 sps:$4 sm:$0xff]   ;;  %v1673_v32 = vld [vmem:[%s1990_s6 + $0x44] ss:$8 sps:$4 sm:$0xff]  }
  0x4c   : > { %1432 = vmatprep.subr.bf16.mxu0 %v1639_v6  ;;  %1541 = vmatprep.subr.bf16.mxu1 %v1639_v6  ;;  %v1672_v31 = vld [vmem:[%s1990_s6 + $0xb0] ss:$8 sps:$4 sm:$0xff]   ;;  %v1675_v33 = vld [vmem:[%s1990_s6 + $0xc4] ss:$8 sps:$4 sm:$0xff]   ;;  %v1677_v34 = vld [vmem:[%s1990_s6 + $0x40] ss:$8 sps:$4 sm:$0xff]   ;;  %p1761_p5 = pnand %p1760_p3, %p1754_p10 }
  0x4d   : > { %v1678_v35 = vld [vmem:[%s1990_s6 + $0xc0] ss:$8 sps:$4 sm:$0xff]   ;;  %v1679_v36 = vld [vmem:[%s1990_s6 + $0x54] ss:$8 sps:$4 sm:$0xff]   ;;  %v1683_v38 = vld [vmem:[%s1990_s6 + $0x50] ss:$8 sps:$4 sm:$0xff]  }
  0x4e   : > { %v1681_v37 = vld [vmem:[%s1990_s6 + $0xd4] ss:$8 sps:$4 sm:$0xff]   ;;  %v1684_v39 = vld [vmem:[%s1990_s6 + $0xd0] ss:$8 sps:$4 sm:$0xff]   ;;  %v1685_v40 = vld [vmem:[%s1990_s6 + $0x64] ss:$8 sps:$4 sm:$0xff]  }
  0x4f   : > { %1433 = vmatpush3.bf16.msra.mxu0 %v1640_v7  ;;  %1549 = vmatpush3.bf16.msra.mxu1 %v1640_v7  ;;  %v1687_v41 = vld [vmem:[%s1990_s6 + $0xe4] ss:$8 sps:$4 sm:$0xff]   ;;  %v1689_v42 = vld [vmem:[%s1990_s6 + $0x60] ss:$8 sps:$4 sm:$0xff]   ;;  %v1691_v44 = vld [vmem:[%s1990_s6 + $0x74] ss:$8 sps:$4 sm:$0xff]  }
  0x50   : > { %1434 = vmatprep.subr.bf16.mxu0 %v1641_v8  ;;  %1542 = vmatprep.subr.bf16.mxu1 %v1641_v8  ;;  %v1690_v43 = vld [vmem:[%s1990_s6 + $0xe0] ss:$8 sps:$4 sm:$0xff]   ;;  %v1693_v45 = vld [vmem:[%s1990_s6 + $0xf4] ss:$8 sps:$4 sm:$0xff]   ;;  %v1695_v46 = vld [vmem:[%s1990_s6 + $0x70] ss:$8 sps:$4 sm:$0xff]  }
  0x51   : > { %v1696_v47 = vld [vmem:[%s1990_s6 + $0xf0] ss:$8 sps:$4 sm:$0xff]   ;;  %v2035_v51 = vld [vmem:[%s2182_s2] ss:$0 sm:$0xff] }
  0x52   : > { %v2042_v59 = vld [vmem:[%s2183_s3] ss:$0 sm:$0xff] }
  0x53   : > { %1435 = vmatpush3.bf16.msra.mxu0 %v1642_v9  ;;  %1550 = vmatpush3.bf16.msra.mxu1 %v1642_v9 }
  0x54   : > { %1436 = vmatprep.subr.bf16.mxu0 %v1643_v10  ;;  %1543 = vmatprep.subr.bf16.mxu1 %v1643_v10 }
  0x57   : > { %1437 = vmatpush3.bf16.msra.mxu0 %v1644_v13  ;;  %1551 = vmatpush3.bf16.msra.mxu1 %v1644_v13 }
  0x58   : > { %1438 = vmatprep.subr.bf16.mxu0 %v1645_v14  ;;  %1544 = vmatprep.subr.bf16.mxu1 %v1645_v14 }
  0x5b   : > { %1439 = vmatpush3.bf16.msra.mxu0 %v1646_v15  ;;  %1552 = vmatpush3.bf16.msra.mxu1 %v1646_v15 }
  0x5c   : > { %1440 = vmatprep.subr.bf16.mxu0 %v1647_v16  ;;  %1545 = vmatprep.subr.bf16.mxu1 %v1647_v16 }
  0x5f   : > { %1441 = vmatpush3.bf16.msra.mxu0 %v1648_v17  ;;  %1553 = vmatpush3.bf16.msra.mxu1 %v1648_v17 }
  0x62   : > { %654 = vmatmul.mubr.bf16.vlgmr.msra.gmra.mxu0 %v1649_v18  ;;  %718 = vmatmul.mubr.bf16.vlgmr.msra.gmra.mxu1 %v1652_v19 }
  0x63   : > { %661 = vmatprep.mubr.bf16.mxu0 %v1655_v20  ;;  %725 = vmatprep.mubr.bf16.mxu1 %v1657_v21 }
  0x6a   : > { %662 = vmatmul.mubr.bf16.gmra.mxu0 %v1659_v22  ;;  %726 = vmatmul.mubr.bf16.gmra.mxu1 %v1660_v23 }
  0x6b   : > { %669 = vmatprep.mubr.bf16.mxu0 %v1661_v24  ;;  %733 = vmatprep.mubr.bf16.mxu1 %v1663_v25 }
  0x72   : > { %670 = vmatmul.mubr.bf16.gmra.mxu0 %v1665_v26  ;;  %734 = vmatmul.mubr.bf16.gmra.mxu1 %v1666_v27 }
  0x73   : > { %677 = vmatprep.mubr.bf16.mxu0 %v1667_v28  ;;  %741 = vmatprep.mubr.bf16.mxu1 %v1669_v29 }
  0x7a   : > { %678 = vmatmul.mubr.bf16.gmra.mxu0 %v1671_v30  ;;  %742 = vmatmul.mubr.bf16.gmra.mxu1 %v1672_v31 }
  0x7b   : > { %685 = vmatprep.mubr.bf16.mxu0 %v1673_v32  ;;  %749 = vmatprep.mubr.bf16.mxu1 %v1675_v33 }
  0x82   : > { %686 = vmatmul.mubr.bf16.gmra.mxu0 %v1677_v34  ;;  %750 = vmatmul.mubr.bf16.gmra.mxu1 %v1678_v35 }
  0x83   : > { %693 = vmatprep.mubr.bf16.mxu0 %v1679_v36  ;;  %757 = vmatprep.mubr.bf16.mxu1 %v1681_v37 }
  0x8a   : > { %694 = vmatmul.mubr.bf16.gmra.mxu0 %v1683_v38  ;;  %758 = vmatmul.mubr.bf16.gmra.mxu1 %v1684_v39 }
  0x8b   : > { %701 = vmatprep.mubr.bf16.mxu0 %v1685_v40  ;;  %765 = vmatprep.mubr.bf16.mxu1 %v1687_v41 }
  0x92   : > { %702 = vmatmul.mubr.bf16.gmra.mxu0 %v1689_v42  ;;  %766 = vmatmul.mubr.bf16.gmra.mxu1 %v1690_v43 }
  0x93   : > { %709 = vmatprep.mubr.bf16.mxu0 %v1691_v44  ;;  %773 = vmatprep.mubr.bf16.mxu1 %v1693_v45 }
  0x9a   : > { %710 = vmatmul.mubr.bf16.gmra.mxu0 %v1695_v46  ;;  %774 = vmatmul.mubr.bf16.gmra.mxu1 %v1696_v47 }
 0x122   : > { %v1442_v48 = vpop.f32.mrf.mxu0  ;;  %v1490_v49 = vpop.f32.mrf.mxu1 }
 0x124   : > { %v1443_v50 = vpop.f32.mrf.mxu0  ;;  %v1491_v52 = vpop.f32.mrf.mxu1 }
 0x125   : > { %v1444_v53 = vadd.f32 %v1443_v50, %v1442_v48  ;;  %v1492_v54 = vadd.f32 %v1491_v52, %v1490_v49 }
 0x126   : > { %v1445_v55 = vpop.f32.mrf.mxu0  ;;  %v1493_v56 = vpop.f32.mrf.mxu1 }
 0x127   : > { %v789_v57 = vmul.f32 %v1444_v53, %v2035_v51  ;;  %v805_v58 = vmul.f32 %v1492_v54, %v2035_v51 }
 0x128   : > { %v1446_v60 = vpop.f32.mrf.mxu0  ;;  %v1494_v61 = vpop.f32.mrf.mxu1 }
 0x129   : > { %v1447_v62 = vadd.f32 %v1446_v60, %v1445_v55  ;;  %v1495_v63 = vadd.f32 %v1494_v61, %v1493_v56  ;;  %v828_v2 = vadd.f32 %v2042_v59, %v789_v57  ;;  %v844_v3 = vadd.f32 %v2042_v59, %v805_v58 }
 0x12a   : > { %v1448_v0 = vpop.f32.mrf.mxu0  ;;  %v1496_v1 = vpop.f32.mrf.mxu1 }
 0x12b   : > { %v790_v4 = vmul.f32 %v1447_v62, %v2035_v51  ;;  %v806_v5 = vmul.f32 %v1495_v63, %v2035_v51  ;;  %v860_v14 = vmax.f32 %v828_v2, 0.0  ;;  %v876_v15 = vmax.f32 %v844_v3, 0.0 }
 0x12c   : > { %v1449_v6 = vpop.f32.mrf.mxu0  ;;  %v1497_v7 = vpop.f32.mrf.mxu1 }
 0x12d   : > { %v829_v8 = vadd.f32 %v2042_v59, %v790_v4  ;;  %v845_v9 = vadd.f32 %v2042_v59, %v806_v5  ;;  %v1450_v10 = vadd.f32 %v1449_v6, %v1448_v0  ;;  %v1498_v11 = vadd.f32 %v1497_v7, %v1496_v1 }
 0x12e   : > { %v1451_v12 = vpop.f32.mrf.mxu0  ;;  %v1499_v13 = vpop.f32.mrf.mxu1 }
 0x12f   : > { %v861_v16 = vmax.f32 %v829_v8, 0.0  ;;  %v877_v17 = vmax.f32 %v845_v9, 0.0  ;;  %v791_v18 = vmul.f32 %v1450_v10, %v2035_v51  ;;  %v807_v19 = vmul.f32 %v1498_v11, %v2035_v51 }
 0x130   : > { %v1452_v20 = vpop.f32.mrf.mxu0  ;;  %v1500_v21 = vpop.f32.mrf.mxu1 }
 0x131   : > { %v1334_v22 = vpack.c.bf16 %v861_v16, %v860_v14  ;;  %v1374_v23 = vpack.c.bf16 %v877_v17, %v876_v15  ;;  %v1453_v24 = vadd.f32 %v1452_v20, %v1451_v12  ;;  %v1501_v25 = vadd.f32 %v1500_v21, %v1499_v13 }
 0x132   : > { %v1454_v26 = vpop.f32.mrf.mxu0  ;;  %v1502_v27 = vpop.f32.mrf.mxu1  ;;  %v830_v28 = vadd.f32 %v2042_v59, %v791_v18  ;;  %v846_v29 = vadd.f32 %v2042_v59, %v807_v19 }
 0x133   : > { %1335 = vst [vmem:[%s2053_s9] sm:$0xff] %v1334_v22   ;;  %1418 = vst [vmem:[%s2053_s9 + $0x40] sm:$0xff] %v1374_v23   ;;  %v792_v30 = vmul.f32 %v1453_v24, %v2035_v51  ;;  %v808_v31 = vmul.f32 %v1501_v25, %v2035_v51 }
 0x134   : > { %v1455_v32 = vpop.f32.mrf.mxu0  ;;  %v1503_v33 = vpop.f32.mrf.mxu1  ;;  %v862_v42 = vmax.f32 %v830_v28, 0.0  ;;  %v878_v43 = vmax.f32 %v846_v29, 0.0 }
 0x135   : > { %v1456_v34 = vadd.f32 %v1455_v32, %v1454_v26  ;;  %v1504_v35 = vadd.f32 %v1503_v33, %v1502_v27  ;;  %v831_v36 = vadd.f32 %v2042_v59, %v792_v30  ;;  %v847_v37 = vadd.f32 %v2042_v59, %v808_v31 }
 0x136   : > { %v1457_v38 = vpop.f32.mrf.mxu0  ;;  %v1505_v39 = vpop.f32.mrf.mxu1 }
 0x137   : > { %v793_v40 = vmul.f32 %v1456_v34, %v2035_v51  ;;  %v809_v41 = vmul.f32 %v1504_v35, %v2035_v51  ;;  %v863_v44 = vmax.f32 %v831_v36, 0.0  ;;  %v879_v45 = vmax.f32 %v847_v37, 0.0 }
 0x138   : > { %v1458_v46 = vpop.f32.mrf.mxu0  ;;  %v1506_v47 = vpop.f32.mrf.mxu1 }
 0x139   : > { %v1459_v48 = vadd.f32 %v1458_v46, %v1457_v38  ;;  %v1507_v49 = vadd.f32 %v1506_v47, %v1505_v39  ;;  %v1339_v50 = vpack.c.bf16 %v863_v44, %v862_v42  ;;  %v1379_v52 = vpack.c.bf16 %v879_v45, %v878_v43 }
 0x13a   : > { %v1460_v53 = vpop.f32.mrf.mxu0  ;;  %v1508_v54 = vpop.f32.mrf.mxu1  ;;  %v832_v55 = vadd.f32 %v2042_v59, %v793_v40  ;;  %v848_v56 = vadd.f32 %v2042_v59, %v809_v41 }
 0x13b   : > { %v794_v57 = vmul.f32 %v1459_v48, %v2035_v51  ;;  %v810_v58 = vmul.f32 %v1507_v49, %v2035_v51  ;;  %1411 = vst [vmem:[%s2053_s9 + $0x8] sm:$0xff] %v1339_v50   ;;  %1419 = vst [vmem:[%s2053_s9 + $0x48] sm:$0xff] %v1379_v52  }
 0x13c   : > { %v1461_v60 = vpop.f32.mrf.mxu0  ;;  %v1509_v61 = vpop.f32.mrf.mxu1  ;;  %v864_v4 = vmax.f32 %v832_v55, 0.0  ;;  %v880_v5 = vmax.f32 %v848_v56, 0.0 }
 0x13d   : > { %v833_v62 = vadd.f32 %v2042_v59, %v794_v57  ;;  %v849_v63 = vadd.f32 %v2042_v59, %v810_v58  ;;  %v1462_v0 = vadd.f32 %v1461_v60, %v1460_v53  ;;  %v1510_v1 = vadd.f32 %v1509_v61, %v1508_v54 }
 0x13e   : > { %v1463_v2 = vpop.f32.mrf.mxu0  ;;  %v1511_v3 = vpop.f32.mrf.mxu1 }
 0x13f   : > { %v865_v6 = vmax.f32 %v833_v62, 0.0  ;;  %v881_v7 = vmax.f32 %v849_v63, 0.0  ;;  %v795_v8 = vmul.f32 %v1462_v0, %v2035_v51  ;;  %v811_v9 = vmul.f32 %v1510_v1, %v2035_v51 }
 0x140   : > { %v1464_v10 = vpop.f32.mrf.mxu0  ;;  %v1512_v11 = vpop.f32.mrf.mxu1 }
 0x141   : > { %v1344_v12 = vpack.c.bf16 %v865_v6, %v864_v4  ;;  %v1384_v13 = vpack.c.bf16 %v881_v7, %v880_v5  ;;  %v1465_v14 = vadd.f32 %v1464_v10, %v1463_v2  ;;  %v1513_v15 = vadd.f32 %v1512_v11, %v1511_v3 }
 0x142   : > { %v1466_v16 = vpop.f32.mrf.mxu0  ;;  %v1514_v17 = vpop.f32.mrf.mxu1  ;;  %v834_v18 = vadd.f32 %v2042_v59, %v795_v8  ;;  %v850_v19 = vadd.f32 %v2042_v59, %v811_v9 }
 0x143   : > { %1412 = vst [vmem:[%s2053_s9 + $0x10] sm:$0xff] %v1344_v12   ;;  %1420 = vst [vmem:[%s2053_s9 + $0x50] sm:$0xff] %v1384_v13   ;;  %v796_v20 = vmul.f32 %v1465_v14, %v2035_v51  ;;  %v812_v21 = vmul.f32 %v1513_v15, %v2035_v51 }
 0x144   : > { %v1467_v22 = vpop.f32.mrf.mxu0  ;;  %v1515_v23 = vpop.f32.mrf.mxu1  ;;  %v866_v32 = vmax.f32 %v834_v18, 0.0  ;;  %v882_v33 = vmax.f32 %v850_v19, 0.0 }
 0x145   : > { %v1468_v24 = vadd.f32 %v1467_v22, %v1466_v16  ;;  %v1516_v25 = vadd.f32 %v1515_v23, %v1514_v17  ;;  %v835_v26 = vadd.f32 %v2042_v59, %v796_v20  ;;  %v851_v27 = vadd.f32 %v2042_v59, %v812_v21 }
 0x146   : > { %v1469_v28 = vpop.f32.mrf.mxu0  ;;  %v1517_v29 = vpop.f32.mrf.mxu1 }
 0x147   : > { %v797_v30 = vmul.f32 %v1468_v24, %v2035_v51  ;;  %v813_v31 = vmul.f32 %v1516_v25, %v2035_v51  ;;  %v867_v34 = vmax.f32 %v835_v26, 0.0  ;;  %v883_v35 = vmax.f32 %v851_v27, 0.0 }
 0x148   : > { %v1470_v36 = vpop.f32.mrf.mxu0  ;;  %v1518_v37 = vpop.f32.mrf.mxu1 }
 0x149   : > { %v1471_v38 = vadd.f32 %v1470_v36, %v1469_v28  ;;  %v1519_v39 = vadd.f32 %v1518_v37, %v1517_v29  ;;  %v1349_v40 = vpack.c.bf16 %v867_v34, %v866_v32  ;;  %v1389_v41 = vpack.c.bf16 %v883_v35, %v882_v33 }
 0x14a   : > { %v1472_v42 = vpop.f32.mrf.mxu0  ;;  %v1520_v43 = vpop.f32.mrf.mxu1  ;;  %v836_v44 = vadd.f32 %v2042_v59, %v797_v30  ;;  %v852_v45 = vadd.f32 %v2042_v59, %v813_v31 }
 0x14b   : > { %v798_v46 = vmul.f32 %v1471_v38, %v2035_v51  ;;  %v814_v47 = vmul.f32 %v1519_v39, %v2035_v51  ;;  %1413 = vst [vmem:[%s2053_s9 + $0x18] sm:$0xff] %v1349_v40   ;;  %1421 = vst [vmem:[%s2053_s9 + $0x58] sm:$0xff] %v1389_v41  }
 0x14c   : > { %v1473_v48 = vpop.f32.mrf.mxu0  ;;  %v1521_v49 = vpop.f32.mrf.mxu1  ;;  %v868_v57 = vmax.f32 %v836_v44, 0.0  ;;  %v884_v58 = vmax.f32 %v852_v45, 0.0 }
 0x14d   : > { %v837_v50 = vadd.f32 %v2042_v59, %v798_v46  ;;  %v853_v52 = vadd.f32 %v2042_v59, %v814_v47  ;;  %v1474_v53 = vadd.f32 %v1473_v48, %v1472_v42  ;;  %v1522_v54 = vadd.f32 %v1521_v49, %v1520_v43 }
 0x14e   : > { %v1475_v55 = vpop.f32.mrf.mxu0  ;;  %v1523_v56 = vpop.f32.mrf.mxu1 }
 0x14f   : > { %v869_v60 = vmax.f32 %v837_v50, 0.0  ;;  %v885_v61 = vmax.f32 %v853_v52, 0.0  ;;  %v799_v62 = vmul.f32 %v1474_v53, %v2035_v51  ;;  %v815_v63 = vmul.f32 %v1522_v54, %v2035_v51 }
 0x150   : > { %v1476_v0 = vpop.f32.mrf.mxu0  ;;  %v1524_v1 = vpop.f32.mrf.mxu1 }
 0x151   : > { %v1354_v2 = vpack.c.bf16 %v869_v60, %v868_v57  ;;  %v1394_v3 = vpack.c.bf16 %v885_v61, %v884_v58  ;;  %v1477_v4 = vadd.f32 %v1476_v0, %v1475_v55  ;;  %v1525_v5 = vadd.f32 %v1524_v1, %v1523_v56 }
 0x152   : > { %v1478_v6 = vpop.f32.mrf.mxu0  ;;  %v1526_v7 = vpop.f32.mrf.mxu1  ;;  %v838_v8 = vadd.f32 %v2042_v59, %v799_v62  ;;  %v854_v9 = vadd.f32 %v2042_v59, %v815_v63 }
 0x153   : > { %1414 = vst [vmem:[%s2053_s9 + $0x20] sm:$0xff] %v1354_v2   ;;  %1422 = vst [vmem:[%s2053_s9 + $0x60] sm:$0xff] %v1394_v3   ;;  %v800_v10 = vmul.f32 %v1477_v4, %v2035_v51  ;;  %v816_v11 = vmul.f32 %v1525_v5, %v2035_v51 }
 0x154   : > { %v1479_v12 = vpop.f32.mrf.mxu0  ;;  %v1527_v13 = vpop.f32.mrf.mxu1  ;;  %v870_v22 = vmax.f32 %v838_v8, 0.0  ;;  %v886_v23 = vmax.f32 %v854_v9, 0.0 }
 0x155   : > { %v1480_v14 = vadd.f32 %v1479_v12, %v1478_v6  ;;  %v1528_v15 = vadd.f32 %v1527_v13, %v1526_v7  ;;  %v839_v16 = vadd.f32 %v2042_v59, %v800_v10  ;;  %v855_v17 = vadd.f32 %v2042_v59, %v816_v11 }
 0x156   : > { %v1481_v18 = vpop.f32.mrf.mxu0  ;;  %v1529_v19 = vpop.f32.mrf.mxu1 }
 0x157   : > { %v801_v20 = vmul.f32 %v1480_v14, %v2035_v51  ;;  %v817_v21 = vmul.f32 %v1528_v15, %v2035_v51  ;;  %v871_v24 = vmax.f32 %v839_v16, 0.0  ;;  %v887_v25 = vmax.f32 %v855_v17, 0.0 }
 0x158   : > { %v1482_v26 = vpop.f32.mrf.mxu0  ;;  %v1530_v27 = vpop.f32.mrf.mxu1 }
 0x159   : > { %v1483_v28 = vadd.f32 %v1482_v26, %v1481_v18  ;;  %v1531_v29 = vadd.f32 %v1530_v27, %v1529_v19  ;;  %v1359_v30 = vpack.c.bf16 %v871_v24, %v870_v22  ;;  %v1399_v31 = vpack.c.bf16 %v887_v25, %v886_v23 }
 0x15a   : > { %v1484_v32 = vpop.f32.mrf.mxu0  ;;  %v1532_v33 = vpop.f32.mrf.mxu1  ;;  %v840_v34 = vadd.f32 %v2042_v59, %v801_v20  ;;  %v856_v35 = vadd.f32 %v2042_v59, %v817_v21 }
 0x15b   : > { %v802_v36 = vmul.f32 %v1483_v28, %v2035_v51  ;;  %v818_v37 = vmul.f32 %v1531_v29, %v2035_v51  ;;  %1415 = vst [vmem:[%s2053_s9 + $0x28] sm:$0xff] %v1359_v30   ;;  %1423 = vst [vmem:[%s2053_s9 + $0x68] sm:$0xff] %v1399_v31  }
 0x15c   : > { %v1485_v38 = vpop.f32.mrf.mxu0  ;;  %v1533_v39 = vpop.f32.mrf.mxu1  ;;  %v872_v46 = vmax.f32 %v840_v34, 0.0  ;;  %v888_v47 = vmax.f32 %v856_v35, 0.0 }
 0x15d   : > { %v841_v40 = vadd.f32 %v2042_v59, %v802_v36  ;;  %v857_v41 = vadd.f32 %v2042_v59, %v818_v37  ;;  %v1486_v42 = vadd.f32 %v1485_v38, %v1484_v32  ;;  %v1534_v43 = vadd.f32 %v1533_v39, %v1532_v33 }
 0x15e   : > { %v1487_v44 = vpop.f32.mrf.mxu0  ;;  %v1535_v45 = vpop.f32.mrf.mxu1 }
 0x15f   : > { %v873_v48 = vmax.f32 %v841_v40, 0.0  ;;  %v889_v49 = vmax.f32 %v857_v41, 0.0  ;;  %v803_v50 = vmul.f32 %v1486_v42, %v2035_v51  ;;  %v819_v52 = vmul.f32 %v1534_v43, %v2035_v51 }
 0x160   : > { %v1488_v53 = vpop.f32.mrf.mxu0  ;;  %v1536_v54 = vpop.f32.mrf.mxu1 }
 0x161   : > { %v1364_v55 = vpack.c.bf16 %v873_v48, %v872_v46  ;;  %v1404_v56 = vpack.c.bf16 %v889_v49, %v888_v47  ;;  %v1489_v57 = vadd.f32 %v1488_v53, %v1487_v44  ;;  %v1537_v58 = vadd.f32 %v1536_v54, %v1535_v45 }
 0x162   : > { %v842_v60 = vadd.f32 %v2042_v59, %v803_v50  ;;  %v858_v61 = vadd.f32 %v2042_v59, %v819_v52 }
 0x163   : > { %1416 = vst [vmem:[%s2053_s9 + $0x30] sm:$0xff] %v1364_v55   ;;  %1424 = vst [vmem:[%s2053_s9 + $0x70] sm:$0xff] %v1404_v56   ;;  %v804_v62 = vmul.f32 %v1489_v57, %v2035_v51  ;;  %v820_v63 = vmul.f32 %v1537_v58, %v2035_v51 }
 0x164   : > { %v874_v2 = vmax.f32 %v842_v60, 0.0  ;;  %v890_v3 = vmax.f32 %v858_v61, 0.0 }
 0x165   : > { %v843_v0 = vadd.f32 %v2042_v59, %v804_v62  ;;  %v859_v1 = vadd.f32 %v2042_v59, %v820_v63 }
 0x167   : > { %v875_v4 = vmax.f32 %v843_v0, 0.0  ;;  %v891_v5 = vmax.f32 %v859_v1, 0.0 }
 0x169   : > { %v1369_v51 = vpack.c.bf16 %v875_v4, %v874_v2  ;;  %v1409_v6 = vpack.c.bf16 %v891_v5, %v890_v3 }
 0x16b   : > { %1417 = vst [vmem:[%s2053_s9 + $0x38] sm:$0xff] %v1369_v51   ;;  %1425 = vst [vmem:[%s2053_s9 + $0x78] sm:$0xff] %v1409_v6  }
 0x16c   : > { %1764 = shalt.err (!%p1761_p5)
}
 0x16d   : > { %s1765_s6 = scalar_lea.hbm %s2128_s29, 2048  ;;  %s1769_s27 = scalar_lea.hbm %s2184_s4, 4096 }
 0x16e   : > { %p1766_p7 = scmp.ne.s32.totalorder %s2128_s29, %s1765_s6  ;;  %p1770_p9 = scmp.lt.s32.totalorder %s2128_s29, %s2184_s4 }
 0x16f   : > { %p1771_p11 = scmp.lt.s32.totalorder %s1769_s27, %s1765_s6 }
 0x170   : > { %p1767_p6 = pnand %p1766_p7, %p1958_p13 }
 0x171   : > { %p1772_p12 = por %p1771_p11, %p1770_p9 }
 0x172   : > { %p1768_p4 = pneg %p1767_p6 }
 0x174   : > { %p1773_p1 = pnand %p1772_p12, %p1768_p4 }
 0x176   : > { %1776 = shalt.err (!%p1773_p1)
}
 0x177   : > { %s1844_s9 = smov 64   ;;  %s1845_s24 = smov 4  }
 0x178   : > { %1560 = dma.vmem_to_hbm [thread:$0]  (%p1958_p13), %s2130_s10, 2048, %s2128_s29, %s1053_s18, %s1844_s9, %s1844_s9, %s1845_s24  }
 0x179 PF: > { %s1082_s14 = sand.u32 1, %s1815_s15   ;;  %p2198_p8 = scmp.ne.s32.totalorder %s2190_s26, 0 }
 0x17a   : > { %p2199_p10 = scmp.ge.s32.totalorder %s1835_s20, 2  ;;  %s1083_s11 = scalar_lea.sflag [#allocation4], %s1082_s14 }
 0x17c   : > { %p1571_p0 = pnand %p2199_p10, %p2198_p8 }
 0x17e   : > { %p1572_p2 = pneg %p1571_p0 }
 0x180   : > { %1810 = dma.done.wait (%p1572_p2), %s1083_s11, 2048  }
 0x181   : > { %1812 = vsyncadd (%p1572_p2), %s1083_s11, 4294965248  ;;  %s21_s20 = sadd.s32 1, %s1835_s20   ;;  %s2200_s15 = smov %s1819_s16 }
 0x182   : > { %p18_p3 = scmp.ge.s32.totalorder %s21_s20, 4   ;;  %s2201_s16 = smov %s1823_s17 }
 0x183   : > { %s2202_s17 = smov %s1967_s28  ;;  %s2203_s18 = smov %s1831_s19 }
 0x184   : > { %s2204_s19 = smov %s2206_s5  ;;  %20 = sbr.rel (!%p18_p3) target bundleno = 9 (0x9), region = 92 }
 0x189   :  { %1088 = vsyncpa [#allocation3], 1 }
 0x18a   :  { %1090 = vsyncpa [#allocation3 + $0x1], 1 }
 0x18b   :  { %1091 = vsyncpa [#allocation6], 1 }
 0x18c   :  { %1092 = vsyncpa [#allocation4], 1 }
 0x18d   :  { %1094 = vsyncpa [#allocation4 + $0x1], 1 }

</bundles_post_ra>
